<compile_context>
chip_gen: v6e
topology: v6e:2x2x1
jax: 0.10.0
libtpu: 0.0.40
codegen_flags: <defaults>
</compile_context>

<pallas_src>
import math

import jax
import jax.numpy as jnp
from jax import lax
from jax.experimental import pallas as pl
from jax.experimental.pallas import tpu as pltpu

_TARGET_BLOCK_ELEMS = 512 * 1024  # ~2 MiB per f32 input tile


def _round_up(x: int, m: int) -> int:
    return ((x + m - 1) // m) * m


def _pick_lane(total: int):
    """Largest multiple of 128 (<=1024) dividing `total` with >=8 rows."""
    for lane in range(1024, 127, -128):
        if total % lane == 0 and total // lane >= 8:
            return lane
    return None


def _make_mse_kernel(n_inner, n_blocks, block_rows, needs_mask, data_rows):
    def _accum(p_ref, t_ref, o_ref, masked, blk):
        d = p_ref[...].astype(jnp.float32) - t_ref[...].astype(jnp.float32)
        if masked:
            # Zero out rows that fall past the real data (partial last block
            # and/or the duplicate block produced by the megacore split).
            r = lax.broadcasted_iota(jnp.int32, d.shape, 0)
            d = jnp.where(blk * block_rows + r < data_rows, d, 0.0)
        sq = d * d
        rb, lanes = sq.shape
        # Fold the tile's row dim onto 8 sublanes with pure VPU adds (the
        # reshape splits the sublane axis on aligned (8,128) tile boundaries).
        o_ref[...] += jnp.sum(sq.reshape(rb // 8, 8, lanes), axis=0)

    def kernel(p_ref, t_ref, o_ref):
        inner = pl.program_id(1)

        @pl.when(inner == 0)
        def _():
            o_ref[...] = jnp.zeros_like(o_ref)

        if not needs_mask:
            _accum(p_ref, t_ref, o_ref, False, None)
        else:
            blk = pl.program_id(0) * n_inner + inner

            @pl.when(blk < n_blocks - 1)
            def _():  # fast path: fully-valid block, no masking
                _accum(p_ref, t_ref, o_ref, False, None)

            @pl.when(blk >= n_blocks - 1)
            def _():  # tail / duplicate block: masked accumulation
                _accum(p_ref, t_ref, o_ref, True, blk)

    return kernel


def diffusion_loss(pred_noise: jax.Array, target_noise: jax.Array) -> jax.Array:
    """MSE loss, matching F.mse_loss(pred, target) with 'mean' reduction."""
    assert pred_noise.shape == target_noise.shape
    total = math.prod(pred_noise.shape)
    itemsize = jnp.dtype(pred_noise.dtype).itemsize

    flat_p = pred_noise.reshape(-1)
    flat_t = target_noise.reshape(-1)

    lane = _pick_lane(total)
    if lane is None:
        # TODO(synk): element counts not divisible by 128 need one zero-pad
        # copy; avoiding it would require manual (pl.ANY) DMA of a 1D view.
        lane = 512
        data_rows = _round_up(pl.cdiv(total, lane), 8)
        padded_total = data_rows * lane
        pad = padded_total - total
        # Identical zero padding on both inputs -> padded region contributes 0.
        flat_p = jnp.pad(flat_p, (0, pad))
        flat_t = jnp.pad(flat_t, (0, pad))
    else:
        data_rows = total // lane  # pure view, no copy

    p2 = flat_p.reshape(data_rows, lane)
    t2 = flat_t.reshape(data_rows, lane)

    target_rows = max(8, (_TARGET_BLOCK_ELEMS // lane) // 8 * 8)
    block_rows = min(_round_up(data_rows, 8), target_rows)
    n_blocks = pl.cdiv(data_rows, block_rows)
    n_outer = 2 if n_blocks >= 2 else 1  # 2-way megacore split (v7x)
    n_inner = pl.cdiv(n_blocks, n_outer)
    needs_mask = (data_rows % block_rows != 0) or (n_outer * n_inner != n_blocks)

    kernel = _make_mse_kernel(n_inner, n_blocks, block_rows, needs_mask, data_rows)

    # Clamp so the (possible) duplicate block of the megacore split stays in
    # range; the kernel masks its contribution to exactly zero.
    in_spec = pl.BlockSpec(
        (block_rows, lane),
        lambda c, i: (jnp.minimum(c * n_inner + i, n_blocks - 1), 0),
    )
    out_spec = pl.BlockSpec((8, lane), lambda c, i: (c, 0))

    tile_bytes = block_rows * lane * itemsize
    # 2 inputs x 2 buffers x tile + output accumulators + headroom.
    vmem_limit = int(2 * 2 * tile_bytes + 2 * 2 * 8 * lane * 4 + (4 << 20))
    vmem_limit = max(vmem_limit, 16 << 20)

    partials = pl.pallas_call(
        kernel,
        out_shape=jax.ShapeDtypeStruct((8 * n_outer, lane), jnp.float32),
        grid=(n_outer, n_inner),
        in_specs=[in_spec, in_spec],
        out_specs=out_spec,
        compiler_params=pltpu.CompilerParams(
            dimension_semantics=("parallel", "arbitrary"),
            vmem_limit_bytes=vmem_limit,
        ),
        cost_estimate=pl.CostEstimate(
            flops=3 * data_rows * lane,
            transcendentals=0,
            bytes_accessed=2 * data_rows * lane * itemsize + 8 * n_outer * lane * 4,
        ),
    )(p2, t2)

    # Tiny final combine (<= 64 KiB of partials) + mean in plain JAX.
    # Divide by the TRUE element count, never a padded count.
    return jnp.sum(partials) * (1.0 / float(total))


if __name__ == "__main__":
    key = jax.random.PRNGKey(0)
    k1, k2, k3, k4, k5, k6 = jax.random.split(key, 6)

    # Small shapes consistent with the module's (B, N, 3) contract.
    B, N, C = 2, 8, 3
    pred_noise = jax.random.normal(k1, (B, N, C), dtype=jnp.float32)
    target_noise = jax.random.normal(k2, (B, N, C), dtype=jnp.float32)

    loss = jax.block_until_ready(diffusion_loss(pred_noise, target_noise))
    ref = jnp.mean((pred_noise - target_noise) ** 2)
    assert jnp.allclose(loss, ref, rtol=1e-6, atol=1e-6), (loss, ref)

    # Zero-copy path: lane-divisible total, partial last row-block (in-kernel
    # masking) and 2-way outer split.
    B2, N2 = 2, 131072
    p_a = jax.random.normal(k3, (B2, N2, C), dtype=jnp.float32)
    t_a = jax.random.normal(k4, (B2, N2, C), dtype=jnp.float32)
    loss_a = jax.block_until_ready(diffusion_loss(p_a, t_a))
    ref_a = jnp.mean((p_a - t_a) ** 2)
    assert jnp.allclose(loss_a, ref_a, rtol=1e-5, atol=1e-6), (loss_a, ref_a)

    # Unaligned total: minimal zero-pad fallback + odd block count (clamped /
    # masked duplicate block on the outer split).
    B3, N3 = 2, 180_000
    p_b = jax.random.normal(k5, (B3, N3, C), dtype=jnp.float32)
    t_b = jax.random.normal(k6, (B3, N3, C), dtype=jnp.float32)
    loss_b = jax.block_until_ready(diffusion_loss(p_b, t_b))
    ref_b = jnp.mean((p_b - t_b) ** 2)
    assert jnp.allclose(loss_b, ref_b, rtol=1e-5, atol=1e-6), (loss_b, ref_b)

    print("KERNEL_OK")
</pallas_src>

<mosaic_0001>
module attributes {stable_mosaic.version = 11 : i64} {
  func.func @kernel(%arg0: i32, %arg1: i32, %arg2: memref<8x512xf32, #tpu.memory_space<vmem>>, %arg3: memref<8x512xf32, #tpu.memory_space<vmem>>, %arg4: memref<8x512xf32, #tpu.memory_space<vmem>>) attributes {dimension_semantics = [#tpu.dimension_semantics<parallel>, #tpu.dimension_semantics<arbitrary>], iteration_bounds = array<i64: 1, 1>, scalar_prefetch = 0 : i64, scratch_operands = 0 : i64, tpu.core_type = #tpu.core_type<tc>, window_params = [{transform_indices = @transform_0, window_bounds = array<i64: 8, 512>}, {transform_indices = @transform_1, window_bounds = array<i64: 8, 512>}, {transform_indices = @transform_2, window_bounds = array<i64: 8, 512>}]} {
    %c0_i32 = arith.constant 0 : i32
    %0 = arith.cmpi eq, %arg1, %c0_i32 : i32
    %1 = arith.extui %0 : i1 to i32
    %c0_i32_0 = arith.constant 0 : i32
    %2 = arith.cmpi ne, %1, %c0_i32_0 : i32
    scf.if %2 {
      %cst_8 = arith.constant 0.000000e+00 : f32
      %12 = vector.broadcast %cst_8 : f32 to vector<8x512xf32>
      %c0_9 = arith.constant 0 : index
      %c0_10 = arith.constant 0 : index
      %13 = vector.load %arg4[%c0_9, %c0_10] : memref<8x512xf32, #tpu.memory_space<vmem>>, vector<8x512xf32>
      tpu.vector_store %arg4[%c0_9, %c0_10], %12 {strides = array<i32>} : memref<8x512xf32, #tpu.memory_space<vmem>>, vector<8x512xf32>,
    } else {
    }
    %c0 = arith.constant 0 : index
    %c0_1 = arith.constant 0 : index
    %3 = vector.load %arg2[%c0, %c0_1] : memref<8x512xf32, #tpu.memory_space<vmem>>, vector<8x512xf32>
    %c0_2 = arith.constant 0 : index
    %c0_3 = arith.constant 0 : index
    %4 = vector.load %arg3[%c0_2, %c0_3] : memref<8x512xf32, #tpu.memory_space<vmem>>, vector<8x512xf32>
    %5 = arith.subf %3, %4 : vector<8x512xf32>
    %6 = arith.mulf %5, %5 : vector<8x512xf32>
    %c0_4 = arith.constant 0 : index
    %c0_5 = arith.constant 0 : index
    %7 = vector.load %arg4[%c0_4, %c0_5] : memref<8x512xf32, #tpu.memory_space<vmem>>, vector<8x512xf32>
    %8 = vector.shape_cast %6 : vector<8x512xf32> to vector<1x8x512xf32>
    %cst = arith.constant dense<0.000000e+00> : vector<8x512xf32>
    %9 = vector.multi_reduction <add>, %8, %cst [0] : vector<1x8x512xf32> to vector<8x512xf32>
    %10 = arith.addf %7, %9 : vector<8x512xf32>
    %c0_6 = arith.constant 0 : index
    %c0_7 = arith.constant 0 : index
    %11 = vector.load %arg4[%c0_6, %c0_7] : memref<8x512xf32, #tpu.memory_space<vmem>>, vector<8x512xf32>
    tpu.vector_store %arg4[%c0_6, %c0_7], %10 {strides = array<i32>} : memref<8x512xf32, #tpu.memory_space<vmem>>, vector<8x512xf32>,
    return
  }
  func.func @transform_0(%arg0: i32, %arg1: i32) -> (i32, i32) {
    %c1_i32 = arith.constant 1 : i32
    %0 = arith.muli %arg0, %c1_i32 : i32
    %1 = arith.addi %0, %arg1 : i32
    %c0_i32 = arith.constant 0 : i32
    %2 = arith.minsi %1, %c0_i32 : i32
    %c0_i32_0 = arith.constant 0 : i32
    %c0_i32_1 = arith.constant 0 : i32
    return %2, %c0_i32_0 : i32, i32
  }
  func.func @transform_1(%arg0: i32, %arg1: i32) -> (i32, i32) {
    %c1_i32 = arith.constant 1 : i32
    %0 = arith.muli %arg0, %c1_i32 : i32
    %1 = arith.addi %0, %arg1 : i32
    %c0_i32 = arith.constant 0 : i32
    %2 = arith.minsi %1, %c0_i32 : i32
    %c0_i32_0 = arith.constant 0 : i32
    %c0_i32_1 = arith.constant 0 : i32
    return %2, %c0_i32_0 : i32, i32
  }
  func.func @transform_2(%arg0: i32, %arg1: i32) -> (i32, i32) {
    %c0_i32 = arith.constant 0 : i32
    %c0_i32_0 = arith.constant 0 : i32
    return %arg0, %c0_i32 : i32, i32
  }
}

</mosaic_0001>

<bundles_post_ra>
// kernel: tpu_custom_call.1
= control target key start
LH: loop header
LB: loop body
LE: loop exit
PB: predicated region body
PF: predicated region fallthrough
CT: control target
= control target key end

     0   :  { %7 = vsyncpa [#allocation3], 0  ;;  %s211_s0 = inlined_call_operand.hbm [shape: f32[8,512], index: 0, kind: input, shape index: {}]   ;;  %s212_s1 = inlined_call_operand.hbm [shape: f32[8,512], index: 1, kind: input, shape index: {}]   ;;  %s213_s2 = inlined_call_operand.hbm [shape: f32[8,512], index: 2, kind: output, shape index: {}]  }
   0x1   :  { %8 = vsyncpa [#allocation6], 0 }
   0x2   :  { %9 = vsyncpa [#allocation4], 0  ;;  %s184_s9 = smov [#allocation2]   ;;  %s185_s11 = smov [#allocation5]  }
   0x3   :  { %s22_s10 = sshll.u32 %s184_s9, 4  ;;  %s38_s12 = sshll.u32 %s185_s11, 4  ;;  %s23_s10 = int_to_ptr.vmem [resolvable:$true] %s22_s10  ;;  %s39_s12 = int_to_ptr.vmem [resolvable:$true] %s38_s12 }
   0x4   :  { %s126_s13 = scalar_lea.vmem %s23_s10, 512  ;;  %p131_p1 = scmp.lt.s32.totalorder %s23_s10, %s23_s10 }
   0x5   :  { %p127_p0 = scmp.ne.s32.totalorder %s23_s10, %s126_s13  ;;  %p132_p2 = scmp.lt.s32.totalorder %s126_s13, %s126_s13 }
   0x7   :  { %p133_p3 = por %p132_p2, %p131_p1 }
   0x9   :  { %p134_p4 = pnand %p133_p3, %p127_p0 }
   0xb   :  { %137 = shalt.err (!%p134_p4)
}
   0xc   :  { %25 = dma.hbm_to_vmem [thread:$0]  %s211_s0, 512, %s23_s10, [#allocation3]  }
   0xd   :  { %s146_s16 = scalar_lea.vmem %s39_s12, 512  ;;  %p151_p6 = scmp.lt.s32.totalorder %s39_s12, %s39_s12 }
   0xe   :  { %p147_p5 = scmp.ne.s32.totalorder %s39_s12, %s146_s16  ;;  %p152_p7 = scmp.lt.s32.totalorder %s146_s16, %s146_s16 }
  0x10   :  { %p153_p8 = por %p152_p7, %p151_p6 }
  0x12   :  { %p154_p9 = pnand %p153_p8, %p147_p5 }
  0x14   :  { %157 = shalt.err (!%p154_p9)
}
  0x15   :  { %41 = dma.hbm_to_vmem [thread:$0]  %s212_s1, 512, %s39_s12, [#allocation6]  }
  0x16   :  { %178 = dma.done.wait [#allocation3], 512  }
  0x17   :  { %179 = vsyncadd [#allocation3], 4294966784 }
  0x18   :  { %180 = dma.done.wait [#allocation6], 512  }
  0x19   :  { %181 = vsyncadd [#allocation6], 4294966784  ;;  %v62_v0 = vld [vmem:[#allocation2] sm:$0xff]  ;;  %v63_v2 = vld [vmem:[#allocation2 + $0x8] sm:$0xff]  ;;  %s186_s0 = smov [#allocation7]  }
  0x1a   :  { %v66_v1 = vld [vmem:[#allocation5] sm:$0xff]  ;;  %v67_v4 = vld [vmem:[#allocation5 + $0x8] sm:$0xff]  ;;  %v64_v5 = vld [vmem:[#allocation2 + $0x10] sm:$0xff]  ;;  %s100_s1 = sshll.u32 %s186_s0, 4  ;;  %s101_s1 = int_to_ptr.vmem [resolvable:$true] %s100_s1 }
  0x1b   :  { %v70_v3 = vsub.f32 %v62_v0, %v66_v1  ;;  %v68_v6 = vld [vmem:[#allocation5 + $0x10] sm:$0xff]  ;;  %v71_v7 = vsub.f32 %v63_v2, %v67_v4  ;;  %v65_v9 = vld [vmem:[#allocation2 + $0x18] sm:$0xff]  ;;  %s158_s19 = scalar_lea.vmem %s101_s1, 512  ;;  %p163_p11 = scmp.lt.s32.totalorder %s101_s1, %s101_s1 }
  0x1c   :  { %v72_v8 = vsub.f32 %v64_v5, %v68_v6  ;;  %v69_v10 = vld [vmem:[#allocation5 + $0x18] sm:$0xff]  ;;  %p159_p10 = scmp.ne.s32.totalorder %s101_s1, %s158_s19  ;;  %p164_p12 = scmp.lt.s32.totalorder %s158_s19, %s158_s19 }
  0x1d   :  { %v74_v11 = vmul.f32 %v70_v3, %v70_v3  ;;  %v73_v12 = vsub.f32 %v65_v9, %v69_v10  ;;  %v75_v13 = vmul.f32 %v71_v7, %v71_v7 }
  0x1e   :  { %v76_v14 = vmul.f32 %v72_v8, %v72_v8  ;;  %p165_p13 = por %p164_p12, %p163_p11 }
  0x1f   :  { %v77_v15 = vmul.f32 %v73_v12, %v73_v12  ;;  %90 = vst [vmem:[#allocation7] sm:$0xff] %v74_v11  ;;  %91 = vst [vmem:[#allocation7 + $0x8] sm:$0xff] %v75_v13 }
  0x20   :  { %92 = vst [vmem:[#allocation7 + $0x10] sm:$0xff] %v76_v14  ;;  %p166_p0 = pnand %p165_p13, %p159_p10 }
  0x21   :  { %93 = vst [vmem:[#allocation7 + $0x18] sm:$0xff] %v77_v15 }
  0x22   :  { %169 = shalt.err (!%p166_p0)
}
  0x23   :  { %103 = dma.vmem_to_hbm [thread:$0]  %s101_s1, 512, %s213_s2, [#allocation4]  }
  0x24   :  { %182 = dma.done.wait [#allocation4], 512  }
  0x25   :  { %183 = vsyncadd [#allocation4], 4294966784 }
  0x26   :  { %107 = vsyncpa [#allocation3], 1 }
  0x27   :  { %108 = vsyncpa [#allocation6], 1 }
  0x28   :  { %109 = vsyncpa [#allocation4], 1 }

</bundles_post_ra>
